<compile_context>
chip_gen: v5e
topology: v5e:2x2
jax: 0.10.0
libtpu: 0.0.40
codegen_flags: <defaults>
</compile_context>

<pallas_src>
import functools

import jax
import jax.numpy as jnp
from jax.experimental import pallas as pl
from jax.experimental.pallas import tpu as pltpu


def _round_up(x, m):
    return (x + m - 1) // m * m


def _vmem_cap_bytes():
    """Per-generation scoped-VMEM cap: ~3/4 of physical, never above 100 MiB.

    v5e/v6e have 128 MiB physical (-> 96 MiB cap), v7x only 64 MiB (-> 48 MiB).
    Falls back to the smallest (v7x-safe) cap if the query is unavailable.
    """
    phys = 64 * 1024 * 1024
    try:
        info = pltpu.get_tpu_info()
        phys = int(getattr(info, "vmem_capacity_bytes", phys))
    except Exception:
        pass
    return min(phys * 3 // 4, 100 * 1024 * 1024)


def mpl_kernel_reassoc(hs_ref, adj_ref, hwn_ref, out_ref, acc_ref):
    """Reassociated path: acc += adj @ (h @ W_nbr); epilogue relu(acc + hs).

    hs_ref:  (TM, O)  f32  h @ W_self + b for the destination rows (resident in k)
    adj_ref: (TM, TK) cb   weighted adjacency tile, adj[dst, src]
    hwn_ref: (TK, O)  cb   (h @ W_nbr) for the source rows
    out_ref: (TM, O)       output node features
    acc_ref: (TM, O)  f32  accumulator for the message-passing reduction
    """
    k = pl.program_id(1)

    @pl.when(k == 0)
    def _():
        acc_ref[...] = jnp.zeros_like(acc_ref)

    acc_ref[...] += jnp.dot(adj_ref[...], hwn_ref[...],
                            preferred_element_type=jnp.float32)

    @pl.when(k == pl.num_programs(1) - 1)
    def _():
        out = acc_ref[...] + hs_ref[...].astype(jnp.float32)
        out_ref[...] = jnp.maximum(out, 0.0).astype(out_ref.dtype)


def mpl_kernel_fused(h_dst_ref, adj_ref, h_src_ref, w_self_ref, w_nbr_ref,
                     b_ref, out_ref, acc_ref):
    """Weights-resident path (used when O >> F): fused Linear+ReLU epilogue.

    h_dst_ref:  (TM, F)  destination-row node features (resident across k)
    adj_ref:    (TM, TK) weighted adjacency tile, adj[dst, src]
    h_src_ref:  (TK, F)  source-row node features
    w_self_ref: (F, O)   Linear weight half applied to node_feats (resident)
    w_nbr_ref:  (F, O)   Linear weight half applied to reduced msgs (resident)
    b_ref:      (1, O)   bias (resident, f32)
    out_ref:    (TM, O)  output node features
    acc_ref:    (TM, F)  f32 accumulator for the message-passing reduction
    """
    k = pl.program_id(1)

    @pl.when(k == 0)
    def _():
        acc_ref[...] = jnp.zeros_like(acc_ref)

    acc_ref[...] += jnp.dot(adj_ref[...], h_src_ref[...],
                            preferred_element_type=jnp.float32)

    @pl.when(k == pl.num_programs(1) - 1)
    def _():
        out = (
            jnp.dot(h_dst_ref[...], w_self_ref[...],
                    preferred_element_type=jnp.float32)
            + jnp.dot(acc_ref[...].astype(w_nbr_ref.dtype), w_nbr_ref[...],
                      preferred_element_type=jnp.float32)
            + b_ref[...]
        )
        out_ref[...] = jnp.maximum(out, 0.0).astype(out_ref.dtype)


@functools.partial(jax.jit, static_argnames=("compute_dtype", "reassociate"))
def mpl_forward(node_feats, adj, w_self, w_nbr, bias,
                compute_dtype=jnp.bfloat16, reassociate=None):
    """node_feats (N,F), adj (N,N) [adj[dst,src]], w_self/w_nbr (F,O), bias (O,).

    adj may also be passed pre-padded to a multiple of 128 and already in
    `compute_dtype`; in that case the wrapper performs no pad/cast copy of it.
    """
    N, F = node_feats.shape
    O = w_self.shape[1]

    # Lane-dense padding: feature/output dims -> multiples of 128 lanes;
    # node dim -> multiple of 128 so tiles satisfy the (8, 128) constraint.
    N_pad = _round_up(N, 128)
    F_pad = _round_up(F, 128)
    O_pad = _round_up(O, 128)

    if reassociate is None:
        # Reassociation is neutral-to-positive when O <= F (per-k operand
        # traffic stays N*O <= N*F); skip it when O >> F.
        reassociate = O_pad <= F_pad

    out_dtype = compute_dtype  # bf16 writeback halves the (N, O) HBM store
    cb = jnp.dtype(compute_dtype).itemsize
    ob = jnp.dtype(out_dtype).itemsize

    # ---- per-generation VMEM budget and tile selection --------------------
    vmem_cap = _vmem_cap_bytes()
    budget = int(vmem_cap * 0.8)  # leave headroom for compiler scratch

    def _need_bytes(tm, tk):
        if reassociate:
            return (2 * (tm * O_pad * 4          # hs (f32), double-buffered
                         + tm * tk * cb          # adj
                         + tk * O_pad * cb)      # hW_nbr
                    + 2 * tm * O_pad * ob        # out
                    + tm * O_pad * 4)            # acc scratch
        return (2 * (tm * F_pad * cb             # h_dst
                     + tm * tk * cb              # adj
                     + tk * F_pad * cb           # h_src
                     + 2 * F_pad * O_pad * cb    # resident weights
                     + O_pad * 4)                # bias
                + 2 * tm * O_pad * ob            # out
                + tm * F_pad * 4)                # acc scratch

    tm_cands = [c for c in (1024, 512, 256, 128, 64, 32, 16, 8) if N_pad % c == 0]
    tk_cands = [c for c in (4096, 2048, 1024, 512, 256, 128) if N_pad % c == 0]
    # Guarantee >= 2 row tiles so "parallel" grid axis 0 can shard across both
    # v7x TensorCores.
    tm_cap = max(N_pad // 2, 8)
    tm_ok = [c for c in tm_cands if c <= tm_cap] or [tm_cands[-1]]

    TM, TK = tm_ok[-1], 128
    for tm in tm_ok:
        for tk in tk_cands:
            if _need_bytes(tm, tk) <= budget:
                TM, TK = tm, tk
                break
        else:
            continue
        break

    grid = (N_pad // TM, N_pad // TK)

    # ---- operand preparation (skip pad/cast copies when already prepared) --
    def _prep(x, rows, cols):
        if x.dtype != compute_dtype:
            x = x.astype(compute_dtype)
        pr, pc = rows - x.shape[0], cols - x.shape[1]
        if pr or pc:
            x = jnp.pad(x, ((0, pr), (0, pc)))
        return x

    a = _prep(adj, N_pad, N_pad)

    compiler_params = pltpu.CompilerParams(
        dimension_semantics=("parallel", "arbitrary"),
        vmem_limit_bytes=vmem_cap,
    )

    if reassociate:
        hf = node_feats.astype(jnp.float32)
        hs = hf @ w_self.astype(jnp.float32) + bias.astype(jnp.float32)  # (N, O)
        hwn = hf @ w_nbr.astype(jnp.float32)                             # (N, O)
        hs_p = jnp.pad(hs, ((0, N_pad - N), (0, O_pad - O)))             # f32
        hwn_p = _prep(hwn, N_pad, O_pad)                                 # compute dtype

        out = pl.pallas_call(
            mpl_kernel_reassoc,
            out_shape=jax.ShapeDtypeStruct((N_pad, O_pad), out_dtype),
            grid=grid,
            in_specs=[
                pl.BlockSpec((TM, O_pad), lambda i, k: (i, 0)),   # hs (dst rows)
                pl.BlockSpec((TM, TK), lambda i, k: (i, k)),      # adj tile
                pl.BlockSpec((TK, O_pad), lambda i, k: (k, 0)),   # hW_nbr (src rows)
            ],
            out_specs=pl.BlockSpec((TM, O_pad), lambda i, k: (i, 0)),
            scratch_shapes=[pltpu.VMEM((TM, O_pad), jnp.float32)],
            compiler_params=compiler_params,
        )(hs_p, a, hwn_p)
    else:
        h = _prep(node_feats, N_pad, F_pad)
        ws = _prep(w_self, F_pad, O_pad)
        wn = _prep(w_nbr, F_pad, O_pad)
        b2 = jnp.pad(bias.astype(jnp.float32), (0, O_pad - O)).reshape(1, O_pad)

        out = pl.pallas_call(
            mpl_kernel_fused,
            out_shape=jax.ShapeDtypeStruct((N_pad, O_pad), out_dtype),
            grid=grid,
            in_specs=[
                pl.BlockSpec((TM, F_pad), lambda i, k: (i, 0)),      # h (dst rows)
                pl.BlockSpec((TM, TK), lambda i, k: (i, k)),         # adj tile
                pl.BlockSpec((TK, F_pad), lambda i, k: (k, 0)),      # h (src rows)
                pl.BlockSpec((F_pad, O_pad), lambda i, k: (0, 0)),   # W_self (resident)
                pl.BlockSpec((F_pad, O_pad), lambda i, k: (0, 0)),   # W_nbr  (resident)
                pl.BlockSpec((1, O_pad), lambda i, k: (0, 0)),       # bias   (resident)
            ],
            out_specs=pl.BlockSpec((TM, O_pad), lambda i, k: (i, 0)),
            scratch_shapes=[pltpu.VMEM((TM, F_pad), jnp.float32)],
            compiler_params=compiler_params,
        )(h, a, h, ws, wn, b2)

    return out[:N, :O]


def mpl_reference(node_feats, adj, w_self, w_nbr, bias):
    reduced = adj @ node_feats
    cat = jnp.concatenate([node_feats, reduced], axis=-1)
    w_full = jnp.concatenate([w_self, w_nbr], axis=0)  # (2F, O)
    return jnp.maximum(cat @ w_full + bias, 0.0)


if __name__ == "__main__":
    # Small synthetic graph: N nodes, F input features, O output features.
    N, F, O = 16, 8, 32

    key = jax.random.PRNGKey(0)
    k_h, k_adj, k_mask, k_ws, k_wn, k_b = jax.random.split(key, 6)

    # node features
    node_feats = jax.random.normal(k_h, (N, F), dtype=jnp.float32)

    # weighted adjacency: random sparse-ish graph with scalar edge feats
    edge_w = jax.random.uniform(k_adj, (N, N), dtype=jnp.float32)
    edge_mask = (jax.random.uniform(k_mask, (N, N)) < 0.3).astype(jnp.float32)
    adj = edge_w * edge_mask  # adj[dst, src]

    # Linear(in_feats*2 -> out_feats): PyTorch-style uniform init, split in two
    bound = 1.0 / jnp.sqrt(jnp.float32(2 * F))
    w_self = jax.random.uniform(k_ws, (F, O), minval=-bound, maxval=bound,
                                dtype=jnp.float32)
    w_nbr = jax.random.uniform(k_wn, (F, O), minval=-bound, maxval=bound,
                               dtype=jnp.float32)
    bias = jax.random.uniform(k_b, (O,), minval=-bound, maxval=bound,
                              dtype=jnp.float32)

    ref = mpl_reference(node_feats, adj, w_self, w_nbr, bias)

    # f32 compute, reassociated (auto) path: near-exact agreement.
    out_f32 = jax.block_until_ready(
        mpl_forward(node_feats, adj, w_self, w_nbr, bias,
                    compute_dtype=jnp.float32))
    assert out_f32.shape == (N, O)
    assert jnp.allclose(out_f32, ref, atol=1e-4, rtol=1e-4), \
        "f32 (reassociated) mismatch vs reference"

    # f32 compute, weights-resident path (the O >> F fallback kernel).
    out_f32_wr = jax.block_until_ready(
        mpl_forward(node_feats, adj, w_self, w_nbr, bias,
                    compute_dtype=jnp.float32, reassociate=False))
    assert out_f32_wr.shape == (N, O)
    assert jnp.allclose(out_f32_wr, ref, atol=1e-4, rtol=1e-4), \
        "f32 (weights-resident) mismatch vs reference"

    # bf16 MXU path (production default): halves adj HBM traffic.
    out_bf16 = jax.block_until_ready(
        mpl_forward(node_feats, adj, w_self, w_nbr, bias))
    assert out_bf16.shape == (N, O)
    assert jnp.allclose(out_bf16.astype(jnp.float32), ref,
                        atol=5e-2, rtol=5e-2), "bf16 mismatch vs reference"

    print("KERNEL_OK")
</pallas_src>

<mosaic_0001>
module attributes {stable_mosaic.version = 11 : i64} {
  func.func @mpl_kernel_reassoc(%arg0: i32, %arg1: i32, %arg2: memref<64x128xf32, #tpu.memory_space<vmem>>, %arg3: memref<64x128xf32, #tpu.memory_space<vmem>>, %arg4: memref<128x128xf32, #tpu.memory_space<vmem>>, %arg5: memref<64x128xf32, #tpu.memory_space<vmem>>, %arg6: memref<64x128xf32, #tpu.memory_space<vmem>>) attributes {dimension_semantics = [#tpu.dimension_semantics<parallel>, #tpu.dimension_semantics<arbitrary>], iteration_bounds = array<i64: 2, 1>, scalar_prefetch = 0 : i64, scratch_operands = 1 : i64, tpu.core_type = #tpu.core_type<tc>, window_params = [{transform_indices = @transform_0, window_bounds = array<i64: 64, 128>}, {transform_indices = @transform_1, window_bounds = array<i64: 64, 128>}, {transform_indices = @transform_2, window_bounds = array<i64: 128, 128>}, {transform_indices = @transform_3, window_bounds = array<i64: 64, 128>}]} {
    %c0_i32 = arith.constant 0 : i32
    %0 = arith.cmpi eq, %arg1, %c0_i32 : i32
    %1 = arith.extui %0 : i1 to i32
    %c0_i32_0 = arith.constant 0 : i32
    %2 = arith.cmpi ne, %1, %c0_i32_0 : i32
    scf.if %2 {
      %cst_10 = arith.constant 0.000000e+00 : f32
      %12 = vector.broadcast %cst_10 : f32 to vector<64x128xf32>
      %c0_11 = arith.constant 0 : index
      %c0_12 = arith.constant 0 : index
      %13 = vector.load %arg6[%c0_11, %c0_12] : memref<64x128xf32, #tpu.memory_space<vmem>>, vector<64x128xf32>
      tpu.vector_store %arg6[%c0_11, %c0_12], %12 {strides = array<i32>} : memref<64x128xf32, #tpu.memory_space<vmem>>, vector<64x128xf32>,
    } else {
    }
    %c0 = arith.constant 0 : index
    %c0_1 = arith.constant 0 : index
    %3 = vector.load %arg6[%c0, %c0_1] : memref<64x128xf32, #tpu.memory_space<vmem>>, vector<64x128xf32>
    %c0_2 = arith.constant 0 : index
    %c0_3 = arith.constant 0 : index
    %4 = vector.load %arg3[%c0_2, %c0_3] : memref<64x128xf32, #tpu.memory_space<vmem>>, vector<64x128xf32>
    %c0_4 = arith.constant 0 : index
    %c0_5 = arith.constant 0 : index
    %5 = vector.load %arg4[%c0_4, %c0_5] : memref<128x128xf32, #tpu.memory_space<vmem>>, vector<128x128xf32>
    %cst = arith.constant dense<0.000000e+00> : vector<64x128xf32>
    %6 = tpu.matmul %4, %5, %cst {dimension_numbers = #tpu.dot_dimension_numbers<[1], [0], [0], [1], [0, 0, 1, 1], [], []>} : vector<64x128xf32>, vector<128x128xf32>, vector<64x128xf32> -> vector<64x128xf32>
    %7 = arith.addf %3, %6 : vector<64x128xf32>
    %c0_6 = arith.constant 0 : index
    %c0_7 = arith.constant 0 : index
    %8 = vector.load %arg6[%c0_6, %c0_7] : memref<64x128xf32, #tpu.memory_space<vmem>>, vector<64x128xf32>
    tpu.vector_store %arg6[%c0_6, %c0_7], %7 {strides = array<i32>} : memref<64x128xf32, #tpu.memory_space<vmem>>, vector<64x128xf32>,
    %c0_i32_8 = arith.constant 0 : i32
    %9 = arith.cmpi eq, %arg1, %c0_i32_8 : i32
    %10 = arith.extui %9 : i1 to i32
    %c0_i32_9 = arith.constant 0 : i32
    %11 = arith.cmpi ne, %10, %c0_i32_9 : i32
    scf.if %11 {
      %c0_10 = arith.constant 0 : index
      %c0_11 = arith.constant 0 : index
      %12 = vector.load %arg6[%c0_10, %c0_11] : memref<64x128xf32, #tpu.memory_space<vmem>>, vector<64x128xf32>
      %c0_12 = arith.constant 0 : index
      %c0_13 = arith.constant 0 : index
      %13 = vector.load %arg2[%c0_12, %c0_13] : memref<64x128xf32, #tpu.memory_space<vmem>>, vector<64x128xf32>
      %14 = arith.addf %12, %13 : vector<64x128xf32>
      %cst_14 = arith.constant 0.000000e+00 : f32
      %15 = vector.broadcast %cst_14 : f32 to vector<64x128xf32>
      %16 = arith.maximumf %14, %15 : vector<64x128xf32>
      %c0_15 = arith.constant 0 : index
      %c0_16 = arith.constant 0 : index
      %17 = vector.load %arg5[%c0_15, %c0_16] : memref<64x128xf32, #tpu.memory_space<vmem>>, vector<64x128xf32>
      tpu.vector_store %arg5[%c0_15, %c0_16], %16 {strides = array<i32>} : memref<64x128xf32, #tpu.memory_space<vmem>>, vector<64x128xf32>,
    } else {
    }
    return
  }
  func.func @transform_0(%arg0: i32, %arg1: i32) -> (i32, i32) {
    %c0_i32 = arith.constant 0 : i32
    %c0_i32_0 = arith.constant 0 : i32
    return %arg0, %c0_i32 : i32, i32
  }
  func.func @transform_1(%arg0: i32, %arg1: i32) -> (i32, i32) {
    %c0_i32 = arith.constant 0 : i32
    return %arg0, %arg1 : i32, i32
  }
  func.func @transform_2(%arg0: i32, %arg1: i32) -> (i32, i32) {
    %c0_i32 = arith.constant 0 : i32
    %c0_i32_0 = arith.constant 0 : i32
    return %arg1, %c0_i32 : i32, i32
  }
  func.func @transform_3(%arg0: i32, %arg1: i32) -> (i32, i32) {
    %c0_i32 = arith.constant 0 : i32
    %c0_i32_0 = arith.constant 0 : i32
    return %arg0, %c0_i32 : i32, i32
  }
}

</mosaic_0001>

<bundles_post_ra>
// kernel: mpl_forward.1
= control target key start
LH: loop header
LB: loop body
LE: loop exit
PB: predicated region body
PF: predicated region fallthrough
CT: control target
= control target key end

     0   :  { %s610_s12 = smov 0   ;;  %s612_s13 = smov 0   ;;  %s712_s0 = inlined_call_operand.vmem [shape: f32[128,128], index: 0, kind: input, shape index: {}]   ;;  %s713_s1 = inlined_call_operand.vmem [shape: f32[128,128], index: 1, kind: input, shape index: {}]   ;;  %s714_s2 = inlined_call_operand.vmem [shape: f32[128,128], index: 2, kind: input, shape index: {}]   ;;  %s715_s3 = inlined_call_operand.vmem [shape: f32[128,128], index: 3, kind: output, shape index: {}]  }
   0x1   :  { %s614_s14 = smov 0  }
   0x2 LB: > { %s25_s15 = sadd.s32 1, %s584_s13  ;;  %p485_p0 = scmp.ge.s32.totalorder %s588_s14, 1  ;;  %s588_s14 = sphi %s614_s14, %s13_s14   ;;  %s584_s13 = sphi %s612_s13, %s717_s13   ;;  %s580_s12 = sphi %s610_s12, %s716_s12  }
   0x3   : > { %p27_p1 = scmp.ge.s32.totalorder %s25_s15, 2  ;;  %p177_p2 = scmp.lt.s32.totalorder %s588_s14, 3 }
   0x5   : > { %s719_s15 = smov (%p27_p1, %s25_s15), 0  ;;  %p178_p3 = pnand %p485_p0, %p177_p2 }
   0x6   : > { %s486_s5 = sshll.u32 (!%p178_p3), %s580_s12, 3 }
   0x7   : > { %181 = sbr.rel (%p178_p3) target bundleno = 190 (0xbe), region = 32  ;;  %p215_p4 = scmp.lt.s32.totalorder (!%p178_p3), %s486_s5, 15 }
   0xc   : > { %v284_v0 = vld [vmem:[%s714_s2 + $0x78] sm:$0xff]  ;;  %v283_v1 = vld [vmem:[%s714_s2 + $0x70] sm:$0xff]  ;;  %v282_v2 = vld [vmem:[%s714_s2 + $0x68] sm:$0xff]  ;;  %s721_s5 = smov (!%p215_p4, %s486_s5), 15 }
   0xd   : > { %495 = vmatpush.msra.mxu2 %v284_v0  ;;  %496 = vmatpush.msra.mxu3 %v284_v0  ;;  %v281_v3 = vld [vmem:[%s714_s2 + $0x60] sm:$0xff]  ;;  %v280_v4 = vld [vmem:[%s714_s2 + $0x58] sm:$0xff]  ;;  %v279_v5 = vld [vmem:[%s714_s2 + $0x50] sm:$0xff]  ;;  %s670_s19 = sshll.u32 %s721_s5, 3 }
   0xe   : > { %285 = vmatpush.msra.mxu0 %v284_v0  ;;  %494 = vmatpush.msra.mxu1 %v284_v0  ;;  %v278_v6 = vld [vmem:[%s714_s2 + $0x48] sm:$0xff]  ;;  %v277_v7 = vld [vmem:[%s714_s2 + $0x40] sm:$0xff]  ;;  %v276_v8 = vld [vmem:[%s714_s2 + $0x38] sm:$0xff]  ;;  %s227_s26 = scalar_lea.vmem %s713_s1, %s670_s19  ;;  %s218_s4 = scalar_lea.vmem %s712_s0, %s670_s19 }
   0xf   : > { %498 = vmatpush.msra.mxu2 %v283_v1  ;;  %499 = vmatpush.msra.mxu3 %v283_v1  ;;  %v275_v9 = vld [vmem:[%s714_s2 + $0x30] sm:$0xff]  ;;  %v274_v10 = vld [vmem:[%s714_s2 + $0x28] sm:$0xff]  ;;  %v273_v11 = vld [vmem:[%s714_s2 + $0x20] sm:$0xff]  ;;  %s693_s7 = scalar_lea.vmem %s715_s3, %s670_s19 }
  0x10   : > { %286 = vmatpush.msra.mxu0 %v283_v1  ;;  %497 = vmatpush.msra.mxu1 %v283_v1  ;;  %v272_v12 = vld [vmem:[%s714_s2 + $0x18] sm:$0xff]  ;;  %v271_v13 = vld [vmem:[%s714_s2 + $0x10] sm:$0xff]  ;;  %v270_v14 = vld [vmem:[%s714_s2 + $0x8] sm:$0xff] }
  0x11   : > { %501 = vmatpush.msra.mxu2 %v282_v2  ;;  %502 = vmatpush.msra.mxu3 %v282_v2  ;;  %v269_v15 = vld [vmem:[%s714_s2] sm:$0xff]  ;;  %v267_v17 = vld [vmem:[%s227_s26 + $0x30] sm:$0xff]  ;;  %v266_v20 = vld [vmem:[%s227_s26 + $0x28] sm:$0xff] }
  0x12   : > { %287 = vmatpush.msra.mxu0 %v282_v2  ;;  %500 = vmatpush.msra.mxu1 %v282_v2  ;;  %v265_v16 = vld [vmem:[%s227_s26 + $0x20] sm:$0xff]  ;;  %v263_v19 = vld [vmem:[%s227_s26 + $0x10] sm:$0xff]  ;;  %v268_v21 = vld [vmem:[%s227_s26 + $0x38] sm:$0xff] }
  0x13   : > { %504 = vmatpush.msra.mxu2 %v281_v3  ;;  %505 = vmatpush.msra.mxu3 %v281_v3  ;;  %v261_v18 = vld [vmem:[%s227_s26] sm:$0xff]  ;;  %v262_v22 = vld [vmem:[%s227_s26 + $0x8] sm:$0xff]  ;;  %v264_v23 = vld [vmem:[%s227_s26 + $0x18] sm:$0xff] }
  0x14   : > { %288 = vmatpush.msra.mxu0 %v281_v3  ;;  %503 = vmatpush.msra.mxu1 %v281_v3  ;;  %v353_v24 = vld [vmem:[%s218_s4] sm:$0xff]  ;;  %v355_v25 = vld [vmem:[%s218_s4 + $0x10] sm:$0xff]  ;;  %v354_v38 = vld [vmem:[%s218_s4 + $0x8] sm:$0xff] }
  0x15   : > { %507 = vmatpush.msra.mxu2 %v280_v4  ;;  %508 = vmatpush.msra.mxu3 %v280_v4  ;;  %v357_v30 = vld [vmem:[%s218_s4 + $0x20] sm:$0xff]  ;;  %v359_v31 = vld [vmem:[%s218_s4 + $0x30] sm:$0xff]  ;;  %v356_v39 = vld [vmem:[%s218_s4 + $0x18] sm:$0xff] }
  0x16   : > { %289 = vmatpush.msra.mxu0 %v280_v4  ;;  %506 = vmatpush.msra.mxu1 %v280_v4  ;;  %v358_v46 = vld [vmem:[%s218_s4 + $0x28] sm:$0xff]  ;;  %v360_v47 = vld [vmem:[%s218_s4 + $0x38] sm:$0xff] }
  0x17   : > { %510 = vmatpush.msra.mxu2 %v279_v5  ;;  %511 = vmatpush.msra.mxu3 %v279_v5 }
  0x18   : > { %290 = vmatpush.msra.mxu0 %v279_v5  ;;  %509 = vmatpush.msra.mxu1 %v279_v5 }
  0x19   : > { %513 = vmatpush.msra.mxu2 %v278_v6  ;;  %514 = vmatpush.msra.mxu3 %v278_v6 }
  0x1a   : > { %291 = vmatpush.msra.mxu0 %v278_v6  ;;  %512 = vmatpush.msra.mxu1 %v278_v6 }
  0x1b   : > { %516 = vmatpush.msra.mxu2 %v277_v7  ;;  %517 = vmatpush.msra.mxu3 %v277_v7 }
  0x1c   : > { %292 = vmatpush.msra.mxu0 %v277_v7  ;;  %515 = vmatpush.msra.mxu1 %v277_v7 }
  0x1d   : > { %519 = vmatpush.msra.mxu2 %v276_v8  ;;  %520 = vmatpush.msra.mxu3 %v276_v8 }
  0x1e   : > { %293 = vmatpush.msra.mxu0 %v276_v8  ;;  %518 = vmatpush.msra.mxu1 %v276_v8 }
  0x1f   : > { %522 = vmatpush.msra.mxu2 %v275_v9  ;;  %523 = vmatpush.msra.mxu3 %v275_v9 }
  0x20   : > { %294 = vmatpush.msra.mxu0 %v275_v9  ;;  %521 = vmatpush.msra.mxu1 %v275_v9 }
  0x21   : > { %525 = vmatpush.msra.mxu2 %v274_v10  ;;  %526 = vmatpush.msra.mxu3 %v274_v10 }
  0x22   : > { %295 = vmatpush.msra.mxu0 %v274_v10  ;;  %524 = vmatpush.msra.mxu1 %v274_v10 }
  0x23   : > { %528 = vmatpush.msra.mxu2 %v273_v11  ;;  %529 = vmatpush.msra.mxu3 %v273_v11 }
  0x24   : > { %296 = vmatpush.msra.mxu0 %v273_v11  ;;  %527 = vmatpush.msra.mxu1 %v273_v11 }
  0x25   : > { %531 = vmatpush.msra.mxu2 %v272_v12  ;;  %532 = vmatpush.msra.mxu3 %v272_v12 }
  0x26   : > { %297 = vmatpush.msra.mxu0 %v272_v12  ;;  %530 = vmatpush.msra.mxu1 %v272_v12 }
  0x27   : > { %534 = vmatpush.msra.mxu2 %v271_v13  ;;  %535 = vmatpush.msra.mxu3 %v271_v13 }
  0x28   : > { %298 = vmatpush.msra.mxu0 %v271_v13  ;;  %533 = vmatpush.msra.mxu1 %v271_v13 }
  0x29   : > { %537 = vmatpush.msra.mxu2 %v270_v14  ;;  %538 = vmatpush.msra.mxu3 %v270_v14 }
  0x2a   : > { %299 = vmatpush.msra.mxu0 %v270_v14  ;;  %536 = vmatpush.msra.mxu1 %v270_v14 }
  0x2b   : > { %540 = vmatpush.msra.mxu2 %v269_v15  ;;  %541 = vmatpush.msra.mxu3 %v269_v15 }
  0x2c   : > { %313 = vmatmul.f32.vlgmr.msra.gmra.mxu2 %v265_v16  ;;  %319 = vmatmul.f32.vlgmr.msra.gmra.mxu3 %v267_v17 }
  0x2d   : > { %300 = vmatpush.msra.mxu0 %v269_v15  ;;  %539 = vmatpush.msra.mxu1 %v269_v15 }
  0x2e   : > { %301 = vmatmul.f32.vlgmr.msra.gmra.mxu0 %v261_v18  ;;  %307 = vmatmul.f32.vlgmr.msra.gmra.mxu1 %v263_v19 }
  0x34   : > { %316 = vmatmul.f32.gmra.mxu2 %v266_v20  ;;  %322 = vmatmul.f32.gmra.mxu3 %v268_v21 }
  0x36   : > { %304 = vmatmul.f32.gmra.mxu0 %v262_v22  ;;  %310 = vmatmul.f32.gmra.mxu1 %v264_v23 }
  0xab   : > { %v302_v26 = vpop.f32.mrf.mxu0  ;;  %v308_v27 = vpop.f32.mrf.mxu1 }
  0xac   : > { %v361_v28 = vadd.f32 %v353_v24, %v302_v26  ;;  %v363_v29 = vadd.f32 %v355_v25, %v308_v27 }
  0xae   : > { %v369_v32 = vmax.f32 %v361_v28, 0.0  ;;  %v371_v33 = vmax.f32 %v363_v29, 0.0 }
  0xaf   : > { %v314_v34 = vpop.f32.mrf.mxu2  ;;  %v320_v35 = vpop.f32.mrf.mxu3 }
  0xb0   : > { %377 = vst [vmem:[%s693_s7] sm:$0xff] %v369_v32  ;;  %v365_v36 = vadd.f32 %v357_v30, %v314_v34  ;;  %v367_v37 = vadd.f32 %v359_v31, %v320_v35 }
  0xb1   : > { %379 = vst [vmem:[%s693_s7 + $0x10] sm:$0xff] %v371_v33 }
  0xb2   : > { %v373_v40 = vmax.f32 %v365_v36, 0.0  ;;  %v375_v41 = vmax.f32 %v367_v37, 0.0 }
  0xb3   : > { %v305_v42 = vpop.f32.mrf.mxu0  ;;  %v311_v43 = vpop.f32.mrf.mxu1 }
  0xb4   : > { %381 = vst [vmem:[%s693_s7 + $0x20] sm:$0xff] %v373_v40  ;;  %v362_v44 = vadd.f32 %v354_v38, %v305_v42  ;;  %v364_v45 = vadd.f32 %v356_v39, %v311_v43 }
  0xb5   : > { %383 = vst [vmem:[%s693_s7 + $0x30] sm:$0xff] %v375_v41 }
  0xb6   : > { %v370_v48 = vmax.f32 %v362_v44, 0.0  ;;  %v372_v49 = vmax.f32 %v364_v45, 0.0 }
  0xb7   : > { %v317_v50 = vpop.f32.mrf.mxu2  ;;  %v323_v51 = vpop.f32.mrf.mxu3 }
  0xb8   : > { %378 = vst [vmem:[%s693_s7 + $0x8] sm:$0xff] %v370_v48  ;;  %v366_v52 = vadd.f32 %v358_v46, %v317_v50  ;;  %v368_v53 = vadd.f32 %v360_v47, %v323_v51 }
  0xb9   : > { %380 = vst [vmem:[%s693_s7 + $0x18] sm:$0xff] %v372_v49 }
  0xba   : > { %v374_v54 = vmax.f32 %v366_v52, 0.0  ;;  %v376_v55 = vmax.f32 %v368_v53, 0.0 }
  0xbc   : > { %382 = vst [vmem:[%s693_s7 + $0x28] sm:$0xff] %v374_v54 }
  0xbd   : > { %384 = vst [vmem:[%s693_s7 + $0x38] sm:$0xff] %v376_v55 }
  0xbe PF: > { %s13_s14 = sadd.s32 1, %s588_s14   ;;  %s716_s12 = smov %s584_s13 }
  0xbf   : > { %p10_p5 = scmp.ge.s32.totalorder %s13_s14, 4   ;;  %s717_s13 = smov %s719_s15 }
  0xc1   :  { %12 = sbr.rel (!%p10_p5) target bundleno = 2 (0x2), region = 76 }

</bundles_post_ra>
